<compile_context>
chip_gen: v7x
topology: tpu7x:2x2x1
jax: 0.10.0
libtpu: 0.0.40
codegen_flags: <defaults>
</compile_context>

<pallas_src>
import functools

import jax
import jax.numpy as jnp
from jax.experimental import pallas as pl
from jax.experimental.pallas import tpu as pltpu

_LANE = 128


def _round_up(x, m):
    return ((x + m - 1) // m) * m


def _vmem_capacity_bytes():
    try:
        cap = getattr(pltpu.get_tpu_info(), "vmem_capacity_bytes", None)
        if cap:
            return int(cap)
    except Exception:
        pass
    return 64 * 1024 * 1024  # conservative default (v7x physical VMEM)


def _soft_dice_kernel(x_ref, t_ref, inter_ref, isum_ref, tsum_ref,
                      acc_inter, acc_isum, acc_tsum, *,
                      s_total, tile_s, tiles_per_part, n_classes,
                      square_nom, square_denom):
    """Grid (N, P, T): batch x spatial-partition (parallel) x spatial tile (reduction).

    Per-step shapes:
      x_ref:          (1, C, tile_s)   prediction tile (f32 or bf16)
      t_ref:          (1, 1, tile_s)   integer label tile (native small int dtype)
      *_ref (outputs) (1, 1, C, 128)   per-(n, p) partial sums, lane-broadcast
      acc_*:          (C, 1) f32       running partial sums (VMEM scratch)
    """
    p = pl.program_id(1)
    t_idx = pl.program_id(2)

    @pl.when(t_idx == 0)
    def _():
        acc_inter[...] = jnp.zeros_like(acc_inter)
        acc_isum[...] = jnp.zeros_like(acc_isum)
        acc_tsum[...] = jnp.zeros_like(acc_tsum)

    # Validity mask for the ragged tail (Pallas edge blocks hold garbage; there
    # is no VMEM bounds check) and for clamped fully-out-of-range tiles.
    start = (p * tiles_per_part + t_idx) * tile_s
    pos = jax.lax.broadcasted_iota(jnp.int32, (1, tile_s), 1) + start
    valid = pos < s_total                                        # (1, tile_s)

    labels = jnp.where(valid, t_ref[0].astype(jnp.int32), -1)    # (1, tile_s)
    cls = jax.lax.broadcasted_iota(jnp.int32, (n_classes, 1), 0)
    onehot = labels == cls                                       # (C, tile_s) bool

    x = x_ref[0]                                                 # (C, tile_s), native dtype
    zero = jnp.zeros((), dtype=x.dtype)
    x_hot = jnp.where(onehot, x, zero)   # one-hot fused as a select (no f32 mask tile)
    x_val = jnp.where(valid, x, zero)    # garbage lanes zeroed for the plain sum

    nom_term = x_hot * x_hot if square_nom else x_hot
    den_term = x_val * x_val if square_denom else x_val

    # TODO(synk): v7x-only — offload these reductions to the idle MXU
    # ([x; ones] @ onehot) if the VALU slot binds at 3.2 TB/s HBM delivery.
    acc_inter[...] += jnp.sum(nom_term, axis=-1, keepdims=True, dtype=jnp.float32)
    acc_isum[...] += jnp.sum(den_term, axis=-1, keepdims=True, dtype=jnp.float32)
    acc_tsum[...] += jnp.sum(jnp.where(onehot, 1.0, 0.0), axis=-1, keepdims=True)

    @pl.when(t_idx == pl.num_programs(2) - 1)
    def _():
        lanes = inter_ref.shape[2:]                              # (C, 128)
        inter_ref[0, 0] = jnp.broadcast_to(acc_inter[...], lanes)
        isum_ref[0, 0] = jnp.broadcast_to(acc_isum[...], lanes)
        tsum_ref[0, 0] = jnp.broadcast_to(acc_tsum[...], lanes)


def soft_dice_loss(inp, target, *, smooth=1.0, reduction="elementwise_mean",
                   weight=None, square_nom=False, square_denom=False,
                   non_lin=None, stream_bf16=False, num_spatial_splits=None,
                   tile_elems=None):
    """inp: (N, C, H, W) float prediction; target: (N, 1, H, W) int labels in [0, C)."""
    N, C, H, W = inp.shape
    S = H * W

    if non_lin is not None:
        # TODO(synk): arbitrary Python callables cannot cross the pallas_call
        # boundary; the non-linearity runs as a separate XLA elementwise op.
        inp = non_lin(inp)

    # Prediction: stream in native dtype (f32 or bf16).  stream_bf16 casts here,
    # which only pays off when the cast fuses with an upstream producer — opt-in.
    x = inp.reshape(N, C, S)
    if stream_bf16:
        x = x.astype(jnp.bfloat16)
    elif x.dtype not in (jnp.float32, jnp.bfloat16):
        x = x.astype(jnp.float32)
    x_bytes = jnp.dtype(x.dtype).itemsize

    # Labels: keep the native small integer dtype; only widen exotic dtypes.
    t = target.reshape(N, 1, S)
    if t.dtype not in (jnp.int8, jnp.uint8, jnp.int16, jnp.int32):
        t = t.astype(jnp.int32)

    # ---- generation-aware tile sizing --------------------------------------
    vmem_cap = _vmem_capacity_bytes()
    # VMEM bytes per spatial element of the double-buffered streamed blocks,
    # counting sublane padding of the (C, tile_s) and (1, tile_s) tiles.
    pred_col = _round_up(C, 32 // x_bytes) * x_bytes
    lbl_col = 32   # (1, tile_s) label block pads to one full sublane tile
    stream_budget = max(4 << 20, min(48 << 20, vmem_cap // 2 - (8 << 20)))
    if tile_elems is None:
        tile_s = (stream_budget // (2 * (pred_col + lbl_col))) // _LANE * _LANE
        tile_s = max(tile_s, 4 * _LANE)
    else:
        tile_s = max(_LANE, _round_up(int(tile_elems), _LANE))
    tile_s = min(tile_s, _round_up(S, _LANE))

    total_tiles = pl.cdiv(S, tile_s)
    if num_spatial_splits is None:
        # Keep both v7x TensorCores busy when the batch axis alone can't; only
        # auto-split when the clamped remainder tile is a small fraction.
        num_spatial_splits = 2 if (N % 2 == 1 and
                                   (total_tiles % 2 == 0 or total_tiles >= 8)) else 1
    P = max(1, min(int(num_spatial_splits), total_tiles))
    T = pl.cdiv(total_tiles, P)
    last_blk = total_tiles - 1

    kernel = functools.partial(
        _soft_dice_kernel, s_total=S, tile_s=tile_s, tiles_per_part=T,
        n_classes=C, square_nom=bool(square_nom), square_denom=bool(square_denom))

    def _stream_idx(n, p, tt):
        # Clamp so a trailing (fully masked) partition tile never DMAs OOB.
        return (n, 0, jnp.minimum(p * T + tt, last_blk))

    out_block = pl.BlockSpec((1, 1, C, _LANE), lambda n, p, tt: (n, p, 0, 0))
    part_shape = jax.ShapeDtypeStruct((N, P, C, _LANE), jnp.float32)

    vmem_limit = (2 * (pred_col + lbl_col) * tile_s           # streamed blocks (x2 buffered)
                  + 3 * 2 * _round_up(C, 8) * _LANE * 4       # output blocks
                  + 3 * 8 * _LANE * 4                         # scratch accumulators
                  + (16 << 20))                               # compiler headroom
    vmem_limit = int(min(max(vmem_limit, 32 << 20), vmem_cap - (4 << 20)))

    inter, isum, tsum = pl.pallas_call(
        kernel,
        out_shape=(part_shape, part_shape, part_shape),
        grid=(N, P, T),
        in_specs=[
            pl.BlockSpec((1, C, tile_s), _stream_idx),
            pl.BlockSpec((1, 1, tile_s), _stream_idx),
        ],
        out_specs=(out_block, out_block, out_block),
        scratch_shapes=[pltpu.VMEM((C, 1), jnp.float32)] * 3,
        compiler_params=pltpu.CompilerParams(
            dimension_semantics=("parallel", "parallel", "arbitrary"),
            vmem_limit_bytes=vmem_limit,
        ),
    )(x, t)

    # Tiny (N, C) epilogue: combine spatial partitions, smooth, ratio, mean.
    inter = jnp.sum(inter[..., 0], axis=1)
    isum = jnp.sum(isum[..., 0], axis=1)
    tsum = jnp.sum(tsum[..., 0], axis=1)
    frac = (2.0 * inter + smooth) / (isum + tsum + smooth)
    if weight is not None:
        frac = jnp.asarray(weight, dtype=frac.dtype) * frac
    per_sample = -jnp.mean(frac, axis=1)

    if reduction == "elementwise_mean":
        return jnp.mean(per_sample)
    if reduction == "none":
        return per_sample
    if reduction == "sum":
        return jnp.sum(per_sample)
    raise AttributeError("Reduction parameter unknown.")


def _reference_soft_dice(inp, target, smooth=1.0, square_nom=False,
                         square_denom=False, weight=None,
                         reduction="elementwise_mean"):
    """Plain-JAX reference mirroring the PyTorch forward."""
    N, C, H, W = inp.shape
    x = inp.astype(jnp.float32)
    onehot = jax.nn.one_hot(target.reshape(N, H, W), C, axis=1, dtype=jnp.float32)
    dims = (2, 3)
    nom = jnp.sum((x * onehot) ** 2 if square_nom else x * onehot, axis=dims)
    nom = 2.0 * nom + smooth
    i_sum = jnp.sum(x ** 2 if square_denom else x, axis=dims)
    t_sum = jnp.sum(onehot ** 2 if square_denom else onehot, axis=dims)
    frac = nom / (i_sum + t_sum + smooth)
    if weight is not None:
        frac = jnp.asarray(weight, jnp.float32) * frac
    per_sample = -jnp.mean(frac, axis=1)
    if reduction == "elementwise_mean":
        return jnp.mean(per_sample)
    if reduction == "sum":
        return jnp.sum(per_sample)
    return per_sample


if __name__ == "__main__":
    key = jax.random.PRNGKey(0)
    k1, k2, k3, k4, k5, k6 = jax.random.split(key, 6)

    # 1) Small shape from the module's intent (lane-aligned, single tile).
    N, C, H, W = 2, 4, 16, 16
    inp = jax.random.uniform(k1, (N, C, H, W), dtype=jnp.float32)
    tgt = jax.random.randint(k2, (N, 1, H, W), 0, C, dtype=jnp.int32)
    loss = jax.block_until_ready(soft_dice_loss(inp, tgt))
    ref = _reference_soft_dice(inp, tgt)
    assert jnp.allclose(loss, ref, atol=1e-5, rtol=1e-5), (loss, ref)

    # square_nom / square_denom variants on the same inputs.
    loss_sq = jax.block_until_ready(
        soft_dice_loss(inp, tgt, square_nom=True, square_denom=True))
    ref_sq = _reference_soft_dice(inp, tgt, square_nom=True, square_denom=True)
    assert jnp.allclose(loss_sq, ref_sq, atol=1e-5, rtol=1e-5), (loss_sq, ref_sq)

    # 2) Non-lane-aligned spatial size: exercises the in-kernel ragged-tail
    #    mask (no wrapper-side padding / re-streaming of the prediction).
    N2, C2, H2, W2 = 2, 3, 200, 200
    inp2 = jax.random.uniform(k3, (N2, C2, H2, W2), dtype=jnp.float32)
    tgt2 = jax.random.randint(k4, (N2, 1, H2, W2), 0, C2, dtype=jnp.int32)
    loss2 = jax.block_until_ready(soft_dice_loss(inp2, tgt2))
    ref2 = _reference_soft_dice(inp2, tgt2)
    assert jnp.allclose(loss2, ref2, atol=1e-5, rtol=1e-5), (loss2, ref2)

    # 3) N=1 with a forced small tile: multi-tile reduction, 2-way spatial
    #    partition (clamped trailing tile fully masked), int8 labels, weights.
    N3, C3, H3, W3 = 1, 5, 45, 45
    inp3 = jax.random.uniform(k5, (N3, C3, H3, W3), dtype=jnp.float32)
    tgt3 = jax.random.randint(k6, (N3, 1, H3, W3), 0, C3).astype(jnp.int8)
    w3 = [0.5, 1.0, 2.0, 1.5, 0.25]
    loss3 = jax.block_until_ready(
        soft_dice_loss(inp3, tgt3, weight=w3, reduction="sum",
                       num_spatial_splits=2, tile_elems=768))
    ref3 = _reference_soft_dice(inp3, tgt3, weight=w3, reduction="sum")
    assert jnp.allclose(loss3, ref3, atol=1e-5, rtol=1e-5), (loss3, ref3)

    # 4) Opt-in bf16 streaming (f32 accumulation) — relaxed tolerance.
    loss_bf16 = jax.block_until_ready(soft_dice_loss(inp2, tgt2, stream_bf16=True))
    assert jnp.allclose(loss_bf16, ref2, atol=2e-2, rtol=2e-2), (loss_bf16, ref2)

    print("KERNEL_OK")
</pallas_src>

<mosaic_0001>
module attributes {stable_mosaic.version = 11 : i64} {
  func.func @_soft_dice_kernel(%arg0: i32, %arg1: i32, %arg2: i32, %arg3: memref<1x4x256xf32, #tpu.memory_space<vmem>>, %arg4: memref<1x1x256xi32, #tpu.memory_space<vmem>>, %arg5: memref<1x1x4x128xf32, #tpu.memory_space<vmem>>, %arg6: memref<1x1x4x128xf32, #tpu.memory_space<vmem>>, %arg7: memref<1x1x4x128xf32, #tpu.memory_space<vmem>>, %arg8: memref<4x1xf32, #tpu.memory_space<vmem>>, %arg9: memref<4x1xf32, #tpu.memory_space<vmem>>, %arg10: memref<4x1xf32, #tpu.memory_space<vmem>>) attributes {dimension_semantics = [#tpu.dimension_semantics<parallel>, #tpu.dimension_semantics<parallel>, #tpu.dimension_semantics<arbitrary>], iteration_bounds = array<i64: 2, 1, 1>, scalar_prefetch = 0 : i64, scratch_operands = 3 : i64, tpu.core_type = #tpu.core_type<tc>, window_params = [{transform_indices = @transform_0, window_bounds = array<i64: 1, 4, 256>}, {transform_indices = @transform_1, window_bounds = array<i64: 1, 1, 256>}, {transform_indices = @transform_2, window_bounds = array<i64: 1, 1, 4, 128>}, {transform_indices = @transform_3, window_bounds = array<i64: 1, 1, 4, 128>}, {transform_indices = @transform_4, window_bounds = array<i64: 1, 1, 4, 128>}]} {
    %c0_i32 = arith.constant 0 : i32
    %0 = arith.cmpi eq, %arg2, %c0_i32 : i32
    %1 = arith.extui %0 : i1 to i32
    %c0_i32_0 = arith.constant 0 : i32
    %2 = arith.cmpi ne, %1, %c0_i32_0 : i32
    scf.if %2 {
      %cst_27 = arith.constant 0.000000e+00 : f32
      %48 = vector.broadcast %cst_27 : f32 to vector<4x1xf32>
      %c0_28 = arith.constant 0 : index
      %c0_29 = arith.constant 0 : index
      %49 = vector.load %arg8[%c0_28, %c0_29] : memref<4x1xf32, #tpu.memory_space<vmem>>, vector<4x1xf32>
      tpu.vector_store %arg8[%c0_28, %c0_29], %48 {strides = array<i32>} : memref<4x1xf32, #tpu.memory_space<vmem>>, vector<4x1xf32>,
      %cst_30 = arith.constant 0.000000e+00 : f32
      %50 = vector.broadcast %cst_30 : f32 to vector<4x1xf32>
      %c0_31 = arith.constant 0 : index
      %c0_32 = arith.constant 0 : index
      %51 = vector.load %arg9[%c0_31, %c0_32] : memref<4x1xf32, #tpu.memory_space<vmem>>, vector<4x1xf32>
      tpu.vector_store %arg9[%c0_31, %c0_32], %50 {strides = array<i32>} : memref<4x1xf32, #tpu.memory_space<vmem>>, vector<4x1xf32>,
      %cst_33 = arith.constant 0.000000e+00 : f32
      %52 = vector.broadcast %cst_33 : f32 to vector<4x1xf32>
      %c0_34 = arith.constant 0 : index
      %c0_35 = arith.constant 0 : index
      %53 = vector.load %arg10[%c0_34, %c0_35] : memref<4x1xf32, #tpu.memory_space<vmem>>, vector<4x1xf32>
      tpu.vector_store %arg10[%c0_34, %c0_35], %52 {strides = array<i32>} : memref<4x1xf32, #tpu.memory_space<vmem>>, vector<4x1xf32>,
    } else {
    }
    %c1_i32 = arith.constant 1 : i32
    %3 = arith.muli %arg1, %c1_i32 : i32
    %4 = arith.addi %3, %arg2 : i32
    %c256_i32 = arith.constant 256 : i32
    %5 = arith.muli %4, %c256_i32 : i32
    %6 = tpu.iota {dimensions = array<i32: 1>} : vector<1x256xi32>
    %7 = vector.broadcast %5 : i32 to vector<1x256xi32>
    %8 = arith.addi %6, %7 : vector<1x256xi32>
    %c256_i32_1 = arith.constant 256 : i32
    %9 = vector.broadcast %c256_i32_1 : i32 to vector<1x256xi32>
    %10 = arith.cmpi slt, %8, %9 : vector<1x256xi32>
    %c0 = arith.constant 0 : index
    %c0_2 = arith.constant 0 : index
    %c0_3 = arith.constant 0 : index
    %11 = vector.load %arg4[%c0, %c0_2, %c0_3] : memref<1x1x256xi32, #tpu.memory_space<vmem>>, vector<1x1x256xi32>
    %12 = vector.shape_cast %11 : vector<1x1x256xi32> to vector<1x256xi32>
    %c-1_i32 = arith.constant -1 : i32
    %13 = vector.broadcast %c-1_i32 : i32 to vector<1x256xi32>
    %14 = arith.select %10, %12, %13 : vector<1x256xi1>, vector<1x256xi32>
    %15 = tpu.iota {dimensions = array<i32: 0>} : vector<4x1xi32>
    %16 = vector.broadcast %14 : vector<1x256xi32> to vector<4x256xi32>
    %17 = vector.broadcast %15 : vector<4x1xi32> to vector<4x256xi32>
    %18 = arith.cmpi eq, %16, %17 : vector<4x256xi32>
    %c0_4 = arith.constant 0 : index
    %c0_5 = arith.constant 0 : index
    %c0_6 = arith.constant 0 : index
    %19 = vector.load %arg3[%c0_4, %c0_5, %c0_6] : memref<1x4x256xf32, #tpu.memory_space<vmem>>, vector<1x4x256xf32>
    %20 = vector.shape_cast %19 : vector<1x4x256xf32> to vector<4x256xf32>
    %cst = arith.constant 0.000000e+00 : f32
    %21 = vector.broadcast %cst : f32 to vector<4x256xf32>
    %22 = arith.select %18, %20, %21 : vector<4x256xi1>, vector<4x256xf32>
    %cst_7 = arith.constant 0.000000e+00 : f32
    %23 = vector.shape_cast %10 : vector<1x256xi1> to vector<1x256xi1>
    %24 = vector.broadcast %23 : vector<1x256xi1> to vector<4x256xi1>
    %25 = vector.broadcast %cst_7 : f32 to vector<4x256xf32>
    %26 = arith.select %24, %20, %25 : vector<4x256xi1>, vector<4x256xf32>
    %c0_8 = arith.constant 0 : index
    %c0_9 = arith.constant 0 : index
    %27 = vector.load %arg8[%c0_8, %c0_9] : memref<4x1xf32, #tpu.memory_space<vmem>>, vector<4x1xf32>
    %cst_10 = arith.constant dense<0.000000e+00> : vector<4xf32>
    %28 = vector.multi_reduction <add>, %22, %cst_10 [1] : vector<4x256xf32> to vector<4xf32>
    %29 = vector.shape_cast %28 : vector<4xf32> to vector<4x1xf32>
    %30 = arith.addf %27, %29 : vector<4x1xf32>
    %c0_11 = arith.constant 0 : index
    %c0_12 = arith.constant 0 : index
    %31 = vector.load %arg8[%c0_11, %c0_12] : memref<4x1xf32, #tpu.memory_space<vmem>>, vector<4x1xf32>
    tpu.vector_store %arg8[%c0_11, %c0_12], %30 {strides = array<i32>} : memref<4x1xf32, #tpu.memory_space<vmem>>, vector<4x1xf32>,
    %c0_13 = arith.constant 0 : index
    %c0_14 = arith.constant 0 : index
    %32 = vector.load %arg9[%c0_13, %c0_14] : memref<4x1xf32, #tpu.memory_space<vmem>>, vector<4x1xf32>
    %cst_15 = arith.constant dense<0.000000e+00> : vector<4xf32>
    %33 = vector.multi_reduction <add>, %26, %cst_15 [1] : vector<4x256xf32> to vector<4xf32>
    %34 = vector.shape_cast %33 : vector<4xf32> to vector<4x1xf32>
    %35 = arith.addf %32, %34 : vector<4x1xf32>
    %c0_16 = arith.constant 0 : index
    %c0_17 = arith.constant 0 : index
    %36 = vector.load %arg9[%c0_16, %c0_17] : memref<4x1xf32, #tpu.memory_space<vmem>>, vector<4x1xf32>
    tpu.vector_store %arg9[%c0_16, %c0_17], %35 {strides = array<i32>} : memref<4x1xf32, #tpu.memory_space<vmem>>, vector<4x1xf32>,
    %c0_18 = arith.constant 0 : index
    %c0_19 = arith.constant 0 : index
    %37 = vector.load %arg10[%c0_18, %c0_19] : memref<4x1xf32, #tpu.memory_space<vmem>>, vector<4x1xf32>
    %cst_20 = arith.constant 1.000000e+00 : f32
    %cst_21 = arith.constant 0.000000e+00 : f32
    %38 = vector.broadcast %cst_20 : f32 to vector<4x256xf32>
    %39 = vector.broadcast %cst_21 : f32 to vector<4x256xf32>
    %40 = arith.select %18, %38, %39 : vector<4x256xi1>, vector<4x256xf32>
    %cst_22 = arith.constant dense<0.000000e+00> : vector<4xf32>
    %41 = vector.multi_reduction <add>, %40, %cst_22 [1] : vector<4x256xf32> to vector<4xf32>
    %42 = vector.shape_cast %41 : vector<4xf32> to vector<4x1xf32>
    %43 = arith.addf %37, %42 : vector<4x1xf32>
    %c0_23 = arith.constant 0 : index
    %c0_24 = arith.constant 0 : index
    %44 = vector.load %arg10[%c0_23, %c0_24] : memref<4x1xf32, #tpu.memory_space<vmem>>, vector<4x1xf32>
    tpu.vector_store %arg10[%c0_23, %c0_24], %43 {strides = array<i32>} : memref<4x1xf32, #tpu.memory_space<vmem>>, vector<4x1xf32>,
    %c0_i32_25 = arith.constant 0 : i32
    %45 = arith.cmpi eq, %arg2, %c0_i32_25 : i32
    %46 = arith.extui %45 : i1 to i32
    %c0_i32_26 = arith.constant 0 : i32
    %47 = arith.cmpi ne, %46, %c0_i32_26 : i32
    scf.if %47 {
      %c0_27 = arith.constant 0 : index
      %c0_28 = arith.constant 0 : index
      %48 = vector.load %arg8[%c0_27, %c0_28] : memref<4x1xf32, #tpu.memory_space<vmem>>, vector<4x1xf32>
      %49 = vector.shape_cast %48 : vector<4x1xf32> to vector<4x1xf32>
      %50 = vector.broadcast %49 : vector<4x1xf32> to vector<4x128xf32>
      %c0_29 = arith.constant 0 : index
      %c0_30 = arith.constant 0 : index
      %c0_31 = arith.constant 0 : index
      %c0_32 = arith.constant 0 : index
      %51 = vector.load %arg5[%c0_29, %c0_30, %c0_31, %c0_32] : memref<1x1x4x128xf32, #tpu.memory_space<vmem>>, vector<1x1x4x128xf32>
      %52 = vector.shape_cast %51 : vector<1x1x4x128xf32> to vector<4x128xf32>
      %53 = vector.shape_cast %50 : vector<4x128xf32> to vector<1x1x4x128xf32>
      tpu.vector_store %arg5[%c0_29, %c0_30, %c0_31, %c0_32], %53 {strides = array<i32>} : memref<1x1x4x128xf32, #tpu.memory_space<vmem>>, vector<1x1x4x128xf32>,
      %c0_33 = arith.constant 0 : index
      %c0_34 = arith.constant 0 : index
      %54 = vector.load %arg9[%c0_33, %c0_34] : memref<4x1xf32, #tpu.memory_space<vmem>>, vector<4x1xf32>
      %55 = vector.shape_cast %54 : vector<4x1xf32> to vector<4x1xf32>
      %56 = vector.broadcast %55 : vector<4x1xf32> to vector<4x128xf32>
      %c0_35 = arith.constant 0 : index
      %c0_36 = arith.constant 0 : index
      %c0_37 = arith.constant 0 : index
      %c0_38 = arith.constant 0 : index
      %57 = vector.load %arg6[%c0_35, %c0_36, %c0_37, %c0_38] : memref<1x1x4x128xf32, #tpu.memory_space<vmem>>, vector<1x1x4x128xf32>
      %58 = vector.shape_cast %57 : vector<1x1x4x128xf32> to vector<4x128xf32>
      %59 = vector.shape_cast %56 : vector<4x128xf32> to vector<1x1x4x128xf32>
      tpu.vector_store %arg6[%c0_35, %c0_36, %c0_37, %c0_38], %59 {strides = array<i32>} : memref<1x1x4x128xf32, #tpu.memory_space<vmem>>, vector<1x1x4x128xf32>,
      %c0_39 = arith.constant 0 : index
      %c0_40 = arith.constant 0 : index
      %60 = vector.load %arg10[%c0_39, %c0_40] : memref<4x1xf32, #tpu.memory_space<vmem>>, vector<4x1xf32>
      %61 = vector.shape_cast %60 : vector<4x1xf32> to vector<4x1xf32>
      %62 = vector.broadcast %61 : vector<4x1xf32> to vector<4x128xf32>
      %c0_41 = arith.constant 0 : index
      %c0_42 = arith.constant 0 : index
      %c0_43 = arith.constant 0 : index
      %c0_44 = arith.constant 0 : index
      %63 = vector.load %arg7[%c0_41, %c0_42, %c0_43, %c0_44] : memref<1x1x4x128xf32, #tpu.memory_space<vmem>>, vector<1x1x4x128xf32>
      %64 = vector.shape_cast %63 : vector<1x1x4x128xf32> to vector<4x128xf32>
      %65 = vector.shape_cast %62 : vector<4x128xf32> to vector<1x1x4x128xf32>
      tpu.vector_store %arg7[%c0_41, %c0_42, %c0_43, %c0_44], %65 {strides = array<i32>} : memref<1x1x4x128xf32, #tpu.memory_space<vmem>>, vector<1x1x4x128xf32>,
    } else {
    }
    return
  }
  func.func @transform_0(%arg0: i32, %arg1: i32, %arg2: i32) -> (i32, i32, i32) {
    %c1_i32 = arith.constant 1 : i32
    %0 = arith.muli %arg1, %c1_i32 : i32
    %1 = arith.addi %0, %arg2 : i32
    %c0_i32 = arith.constant 0 : i32
    %2 = arith.minsi %1, %c0_i32 : i32
    %c0_i32_0 = arith.constant 0 : i32
    %c0_i32_1 = arith.constant 0 : i32
    return %arg0, %c0_i32_0, %2 : i32, i32, i32
  }
  func.func @transform_1(%arg0: i32, %arg1: i32, %arg2: i32) -> (i32, i32, i32) {
    %c1_i32 = arith.constant 1 : i32
    %0 = arith.muli %arg1, %c1_i32 : i32
    %1 = arith.addi %0, %arg2 : i32
    %c0_i32 = arith.constant 0 : i32
    %2 = arith.minsi %1, %c0_i32 : i32
    %c0_i32_0 = arith.constant 0 : i32
    %c0_i32_1 = arith.constant 0 : i32
    return %arg0, %c0_i32_0, %2 : i32, i32, i32
  }
  func.func @transform_2(%arg0: i32, %arg1: i32, %arg2: i32) -> (i32, i32, i32, i32) {
    %c0_i32 = arith.constant 0 : i32
    %c0_i32_0 = arith.constant 0 : i32
    %c0_i32_1 = arith.constant 0 : i32
    return %arg0, %arg1, %c0_i32, %c0_i32_0 : i32, i32, i32, i32
  }
  func.func @transform_3(%arg0: i32, %arg1: i32, %arg2: i32) -> (i32, i32, i32, i32) {
    %c0_i32 = arith.constant 0 : i32
    %c0_i32_0 = arith.constant 0 : i32
    %c0_i32_1 = arith.constant 0 : i32
    return %arg0, %arg1, %c0_i32, %c0_i32_0 : i32, i32, i32, i32
  }
  func.func @transform_4(%arg0: i32, %arg1: i32, %arg2: i32) -> (i32, i32, i32, i32) {
    %c0_i32 = arith.constant 0 : i32
    %c0_i32_0 = arith.constant 0 : i32
    %c0_i32_1 = arith.constant 0 : i32
    return %arg0, %arg1, %c0_i32, %c0_i32_0 : i32, i32, i32, i32
  }
}

</mosaic_0001>

<bundles_post_ra>
// kernel: tpu_custom_call.1
= control target key start
LH: loop header
LB: loop body
LE: loop exit
PB: predicated region body
PF: predicated region fallthrough
CT: control target
= control target key end

     0   :  { %10 = vsyncpa [#allocation6], 0  ;;  %s1327_s0 = inlined_call_operand.hbm [shape: f32[2,4,256], index: 0, kind: input, shape index: {}]   ;;  %s1328_s1 = inlined_call_operand.hbm [shape: s32[2,1,256], index: 1, kind: input, shape index: {}]   ;;  %s1329_s2 = inlined_call_operand.hbm [shape: f32[2,1,4,128], index: 2, kind: output, shape index: {0}]   ;;  %s1330_s3 = inlined_call_operand.hbm [shape: f32[2,1,4,128], index: 3, kind: output, shape index: {1}]   ;;  %s1331_s4 = inlined_call_operand.hbm [shape: f32[2,1,4,128], index: 4, kind: output, shape index: {2}]  }
   0x1   :  { %12 = vsyncpa [#allocation6 + $0x1], 0 }
   0x2   :  { %13 = vsyncpa [#allocation9], 0 }
   0x3   :  { %15 = vsyncpa [#allocation9 + $0x1], 0 }
   0x4   :  { %16 = vsyncpa [#allocation7], 0 }
   0x5   :  { %18 = vsyncpa [#allocation7 + $0x1], 0 }
   0x6   :  { %19 = vsyncpa [#allocation12], 0 }
   0x7   :  { %21 = vsyncpa [#allocation12 + $0x1], 0  ;;  %s1009_s15 = smov 0   ;;  %s1011_s16 = smov 0  }
   0x8   :  { %s1013_s17 = smov 0   ;;  %s1015_s18 = smov 0  }
   0x9   :  { %s1017_s19 = smov 0   ;;  %s1019_s20 = smov 0  }
   0xa LB: > { %s1040_s21 = sadd.s32 4294967295, %s975_s20   ;;  %s1333_s22 = sadd.s32 4294967294, %s975_s20   ;;  %s975_s20 = sphi %s1019_s20, %s27_s20   ;;  %s971_s19 = sphi %s1017_s19, %s1355_s19   ;;  %s967_s18 = sphi %s1015_s18, %s1354_s18   ;;  %s963_s17 = sphi %s1013_s17, %s1353_s17   ;;  %s959_s16 = sphi %s1011_s16, %s1352_s16   ;;  %s955_s15 = sphi %s1009_s15, %s1351_s15  }
   0xb   : > { %s46_s23 = sadd.s32 1, %s971_s19  ;;  %s61_s24 = sadd.s32 1, %s963_s17 }
   0xc   : > { %p48_p0 = scmp.ge.s32.totalorder %s46_s23, 2  ;;  %p68_p1 = scmp.ne.s32.totalorder %s963_s17, %s959_s16 }
   0xd   : > { %p69_p2 = scmp.eq.s32.totalorder %s975_s20, 0  ;;  %p74_p3 = scmp.ne.s32.totalorder %s959_s16, %s955_s15 }
   0xe   : > { %s1357_s23 = smov (%p48_p0, %s46_s23), 0  ;;  %p75_p5 = scmp.eq.s32.totalorder %s1040_s21, 0 }
   0xf   : > { %p1052_p4 = por %p69_p2, %p68_p1  ;;  %s56_s26 = ssub.s32 %s971_s19, %s1357_s23 }
  0x10   : > { %p134_p6 = scmp.eq.s32.totalorder %s1040_s21, 1  ;;  %p59_p7 = scmp.eq.s32.totalorder %s56_s26, 0 }
  0x11   : > { %p1060_p8 = por %p75_p5, %p74_p3  ;;  %p140_p10 = scmp.eq.s32.totalorder %s1333_s22, 1 }
  0x12   : > { %p1064_p9 = por %p134_p6, %p68_p1  ;;  %p714_p13 = scmp.lt.s32.totalorder %s975_s20, 2 }
  0x13   : > { %s1337_s27 = scalar_select %p1060_p8, 1, 0 }
  0x14   : > { %s1338_s28 = scalar_select %p1064_p9, 1, 0 }
  0x15   : > { %s1071_s29 = scalar_select %p59_p7, %s963_s17, %s61_s24  }
  0x16   : > { %p1073_p11 = por %p140_p10, %p74_p3  ;;  %s1080_s5 = sand.u32 1, %s963_s17  }
  0x17   : > { %s665_s6 = sshll.u32 %s1080_s5, 3  ;;  %s685_s7 = sshll.u32 %s971_s19, 7 }
  0x18   : > { %s1339_s30 = scalar_select %p1073_p11, 1, 0 }
  0x19   : > { %s1087_s10 = scalar_lea.hbm %s1327_s0, %s685_s7  ;;  %s220_s11 = scalar_lea.vmem [#allocation5], %s665_s6 }
  0x1a   : > { %s233_s12 = sshll.u32 %s220_s11, 4  ;;  %p1093_p0 = pnand %p714_p13, %p1052_p4  ;;  %s1089_s12 = int_to_ptr.vmem [resolvable:$true] %s233_s12 }
  0x1b   : > { %s217_s14 = scalar_lea.sflag [#allocation6], %s1080_s5  ;;  %s769_s24 = scalar_lea.hbm %s1087_s10, 128 }
  0x1c   : > { %p770_p3 = scmp.ne.s32.totalorder %s1087_s10, %s769_s24  ;;  %p771_p5 = pneg %p1093_p0 }
  0x1d   : > { %s774_s25 = scalar_lea.hbm %s1327_s0, 256  ;;  %p775_p4 = scmp.lt.u32.totalorder %s1087_s10, %s1327_s0 }
  0x1e   : > { %p772_p6 = pnand %p771_p5, %p770_p3  ;;  %p776_p10 = scmp.lt.u32.totalorder %s774_s25, %s769_s24 }
  0x1f   : > { %p778_p12 = scmp.lt.u32.totalorder %s769_s24, %s1087_s10 }
  0x20   : > { %p773_p7 = pneg %p772_p6  ;;  %p777_p13 = por %p776_p10, %p775_p4 }
  0x22   : > { %p779_p1 = por %p778_p12, %p777_p13 }
  0x24   : > { %p780_p2 = pnand %p779_p1, %p773_p7 }
  0x26   : > { %783 = shalt.err (!%p780_p2)
}
  0x27   : > { %s784_s9 = scalar_lea.vmem %s1089_s12, 128  ;;  %s977_s11 = smov [#allocation5]  }
  0x28   : > { %p785_p3 = scmp.ne.s32.totalorder %s1089_s12, %s784_s9  ;;  %s789_s26 = sshll.u32 %s977_s11, 4  ;;  %s790_s26 = int_to_ptr.vmem [resolvable:$false] %s789_s26 }
  0x29   : > { %s791_s6 = scalar_lea.vmem %s790_s26, 256  ;;  %p792_p9 = scmp.lt.s32.totalorder %s1089_s12, %s790_s26 }
  0x2a   : > { %p787_p6 = pnand %p785_p3, %p771_p5  ;;  %p793_p4 = scmp.lt.s32.totalorder %s791_s6, %s784_s9 }
  0x2c   : > { %p788_p11 = pneg %p787_p6  ;;  %p794_p10 = por %p793_p4, %p792_p9 }
  0x2e   : > { %p795_p12 = pnand %p794_p10, %p788_p11 }
  0x30   : > { %798 = shalt.err (!%p795_p12)
}
  0x31   : > { %700 = dma.hbm_to_vmem [thread:$0]  (!%p1093_p0), %s1087_s10, 128, %s1089_s12, %s217_s14  }
  0x32   : > { %p1341_p1 = scmp.lt.s32.totalorder %s975_s20, 3  ;;  %p1342_p2 = scmp.ge.s32.totalorder %s975_s20, 1 }
  0x33   : > { %s668_s25 = sshll.u32 %s1080_s5, 1  ;;  %s686_s7 = sshll.u32 %s971_s19, 5 }
  0x34   : > { %p1129_p7 = pnand %p1342_p2, %p1341_p1  ;;  %s1138_s11 = scalar_lea.hbm %s1328_s1, %s686_s7 }
  0x35   : > { %s244_s26 = scalar_lea.vmem [#allocation8], %s668_s25  ;;  %s241_s10 = scalar_lea.sflag [#allocation9], %s1080_s5 }
  0x36   : > { %s1343_s24 = scalar_select %p1129_p7, 1, 0 }
  0x37   : > { %s257_s6 = sshll.u32 %s244_s26, 4  ;;  %s799_s12 = scalar_lea.hbm %s1138_s11, 32  ;;  %s258_s6 = int_to_ptr.vmem [resolvable:$true] %s257_s6 }
  0x38   : > { %p800_p9 = scmp.ne.s32.totalorder %s1138_s11, %s799_s12  ;;  %s804_s8 = scalar_lea.hbm %s1328_s1, 64 }
  0x39   : > { %p805_p3 = scmp.lt.u32.totalorder %s1138_s11, %s1328_s1  ;;  %p806_p6 = scmp.lt.u32.totalorder %s804_s8, %s799_s12 }
  0x3a   : > { %p802_p11 = pnand %p800_p9, %p771_p5  ;;  %p808_p10 = scmp.lt.u32.totalorder %s799_s12, %s1138_s11 }
  0x3b   : > { %p807_p4 = por %p806_p6, %p805_p3 }
  0x3c   : > { %p803_p13 = pneg %p802_p11 }
  0x3d   : > { %p809_p12 = por %p808_p10, %p807_p4 }
  0x3f   : > { %p810_p1 = pnand %p809_p12, %p803_p13 }
  0x41   : > { %813 = shalt.err (!%p810_p1)
}
  0x42   : > { %s814_s5 = scalar_lea.vmem %s258_s6, 32  ;;  %s978_s25 = smov [#allocation8]  }
  0x43   : > { %p815_p2 = scmp.ne.s32.totalorder %s258_s6, %s814_s5  ;;  %s819_s22 = sshll.u32 %s978_s25, 4  ;;  %s820_s22 = int_to_ptr.vmem [resolvable:$false] %s819_s22 }
  0x44   : > { %s821_s26 = scalar_lea.vmem %s820_s22, 64  ;;  %p822_p8 = scmp.lt.s32.totalorder %s258_s6, %s820_s22 }
  0x45   : > { %p817_p9 = pnand %p815_p2, %p771_p5  ;;  %p823_p7 = scmp.lt.s32.totalorder %s821_s26, %s814_s5 }
  0x47   : > { %p818_p11 = pneg %p817_p9  ;;  %p824_p3 = por %p823_p7, %p822_p8 }
  0x49   : > { %p825_p6 = pnand %p824_p3, %p818_p11 }
  0x4b   : > { %828 = shalt.err (!%p825_p6)
}
  0x4c   : > { %703 = dma.hbm_to_vmem [thread:$0]  (!%p1093_p0), %s1138_s11, 32, %s258_s6, %s241_s10  }
  0x4d   : > { %p1344_p13 = scmp.ne.s32.totalorder %s1343_s24, 0 }
  0x4e   : > { %s1163_s12 = sand.u32 (!%p1344_p13), 1, %s959_s16   ;;  %p1345_p5 = scmp.ne.s32.totalorder (!%p1344_p13), %s1337_s27, 0 }
  0x4f   : > { %266 = sbr.rel (%p1344_p13) target bundleno = 436 (0x1b4), region = 28  ;;  %s672_s14 = sshll.u32 (!%p1344_p13), %s1163_s12, 3 }
  0x50   : > { %s269_s8 = scalar_lea.sflag (!%p1344_p13), [#allocation6], %s1163_s12  ;;  %s272_s7 = scalar_lea.vmem (!%p1344_p13), [#allocation5], %s672_s14 }
  0x56   : > { %938 = dma.done.wait (%p1345_p5), %s269_s8, 128  }
  0x57   : > { %940 = vsyncadd (%p1345_p5), %s269_s8, 4294967168  ;;  %s673_s13 = sshll.u32 %s1163_s12, 1  ;;  %s278_s24 = scalar_lea.sflag [#allocation9], %s1163_s12 }
  0x58   : > { %s281_s11 = scalar_lea.vmem [#allocation8], %s673_s13 }
  0x59   : > { %942 = dma.done.wait (%p1345_p5), %s278_s24, 32  }
  0x5a   : > { %944 = vsyncadd (%p1345_p5), %s278_s24, 4294967264  ;;  %v348_v0 = vlaneseq  ;;  %vm333_vm0 = vcmask 3072   ;;  %v979_v1 = vmov 0.0   ;;  %vm383_vm1 = vcmask 1043456   ;;  %v370_v5 = vld [vmem:[%s272_s7] sm:$0xff]  ;;  %s1190_s27 = sshll.u32 %s1163_s12, 2 }
  0x5b   : > { %335 = vst.msk [vmem:[#allocation3] sm:$0xf] %vm333_vm0, %v979_v1  ;;  %334 = vst.msk [vmem:[#allocation2] sm:$0xf] %vm333_vm0, %v979_v1  ;;  %v347_v6 = vld [vmem:[%s281_s11] sm:$0x3]  ;;  %v372_v7 = vcombine.high %v370_v5, %v370_v5 }
  0x5c   : > { %336 = vst.msk [vmem:[#allocation4] sm:$0xf] %vm333_vm0, %v979_v1  ;;  %v349_v2 = vshrl.u32 %v348_v0, 7  ;;  %v393_v8 = vsel %vm383_vm1, %v370_v5, 0.0  ;;  %v980_v25 = vmov 0   ;;  %s313_s6 = scalar_lea.vmem [#allocation11], %s1190_s27 }
  0x5d   : > { %v394_v11 = vsel %vm383_vm1, %v372_v7, 0.0  ;;  %766 = vset.pattern.permute.xlu1 %v980_v25  ;;  %767 = vset.pattern.permute.xlu0 %v980_v25  ;;  %s473_s10 = sshll.u32 %s313_s6, 4  ;;  %s439_s9 = sand.u32 1, %s1040_s21   ;;  %s1197_s10 = int_to_ptr.vmem [resolvable:$true] %s473_s10 }
  0x5e   : > { %v350_v3 = vsub.s32 0, %v349_v2  ;;  %v354_v4 = vsub.s32 1, %v349_v2  ;;  %v395_v14 = vadd.f32 %v394_v11, %v393_v8  ;;  %s1195_s5 = sshll.u32 %s967_s18, 6  ;;  %s1335_s25 = scalar_lea.vmem [#allocation10], %s1190_s27 }
  0x5f   : > { %s459_s22 = sshll.u32 %s1335_s25, 4  ;;  %s1206_s8 = scalar_lea.hbm %s1330_s3, %s1195_s5  ;;  %s1213_s22 = int_to_ptr.vmem [resolvable:$true] %s459_s22 }
  0x60   : > { %v351_v9 = vrot.slane %v347_v6, %v350_v3  ;;  %v355_v10 = vrot.slane %v347_v6, %v354_v4  ;;  %396 = vadd.xlane.f32.xlu0 %v395_v14  ;;  %s320_s7 = scalar_lea.vmem [#allocation13], %s1190_s27  ;;  %s1215_s21 = scalar_lea.sflag [#allocation12], %s439_s9 }
  0x61   : > { %s1211_s18 = sshll.u32 %s320_s7, 4  ;;  %s829_s13 = scalar_lea.vmem %s1197_s10, 64  ;;  %s1246_s18 = int_to_ptr.vmem [resolvable:$true] %s1211_s18 }
  0x62   : > { %v363_v12 = vrot.slane %v351_v9, %v350_v3  ;;  %v367_v13 = vrot.slane %v355_v10, %v350_v3  ;;  %v392_v26 = vld [vmem:[#allocation3] sm:$0xf]  ;;  %v382_v30 = vld [vmem:[#allocation2] sm:$0xf]  ;;  %p830_p8 = scmp.ne.s32.totalorder %s1197_s10, %s829_s13  ;;  %p1346_p0 = scmp.ne.s32.totalorder %s1338_s28, 0 }
  0x63   : > { %v400_v29 = vld [vmem:[#allocation4] sm:$0xf]  ;;  %s981_s24 = smov [#allocation11]  }
  0x64   : > { %vm368_vm2 = vcmp.eq.s32.totalorder %v363_v12, %v349_v2  ;;  %vm369_vm3 = vcmp.eq.s32.totalorder %v367_v13, %v349_v2  ;;  %p831_p7 = pnand %p830_p8, %p1346_p0  ;;  %s833_s11 = sshll.u32 %s981_s24, 4  ;;  %s834_s11 = int_to_ptr.vmem [resolvable:$false] %s833_s11 }
  0x65   : > { %v401_v15 = vsel %vm368_vm2, 1.0, %v979_v1  ;;  %v402_v16 = vsel %vm369_vm3, 1.0, %v979_v1  ;;  %v374_v17 = vsel %vm368_vm2, %v370_v5, 0.0  ;;  %v375_v18 = vsel %vm369_vm3, %v372_v7, 0.0  ;;  %s835_s26 = scalar_lea.vmem %s834_s11, 128  ;;  %p836_p10 = scmp.lt.s32.totalorder %s1197_s10, %s834_s11 }
  0x66   : > { %v403_v19 = vsel %vm383_vm1, %v401_v15, 0.0  ;;  %v404_v20 = vsel %vm383_vm1, %v402_v16, 0.0  ;;  %v384_v21 = vsel %vm383_vm1, %v374_v17, 0.0  ;;  %v385_v22 = vsel %vm383_vm1, %v375_v18, 0.0  ;;  %p832_p4 = pneg %p831_p7  ;;  %p837_p12 = scmp.lt.s32.totalorder %s835_s26, %s829_s13 }
  0x67   : > { %v405_v23 = vadd.f32 %v404_v20, %v403_v19  ;;  %v386_v24 = vadd.f32 %v385_v22, %v384_v21 }
  0x68   : > { %p838_p1 = por %p837_p12, %p836_p10 }
  0x69   : > { %406 = vadd.xlane.f32.xlu1 %v405_v23  ;;  %387 = vadd.xlane.f32.xlu0 %v386_v24 }
  0x6a   : > { %p839_p2 = pnand %p838_p1, %p832_p4 }
  0xed   : > { %v397_v27 = vpop.xlane.xlu0 %396 }
  0xee   : > { %v398_v28 = vadd.f32 %v397_v27, %v392_v26 }
  0xf0   : > { %399 = vst.msk [vmem:[#allocation3] sm:$0xf] %vm333_vm0, %v398_v28 }
  0xf6   : > { %v407_v31 = vpop.xlane.xlu1 %406  ;;  %v388_v32 = vpop.xlane.xlu0 %387 }
  0xf7   : > { %v408_v33 = vadd.f32 %v407_v31, %v400_v29  ;;  %v389_v34 = vadd.f32 %v388_v32, %v382_v30  ;;  %v420_v35 = vld [vmem:[#allocation3] sm:$0xf] }
  0xf8   : > { %423 = vperm.xlu1 %766, %v420_v35  }
  0xf9   : > { %409 = vst.msk [vmem:[#allocation4] sm:$0xf] %vm333_vm0, %v408_v33  ;;  %391 = vst.msk [vmem:[#allocation2] sm:$0xf] %vm333_vm0, %v389_v34 }
 0x100   : > { %v427_v36 = vld [vmem:[#allocation4] sm:$0xf]  ;;  %v413_v37 = vld [vmem:[#allocation2] sm:$0xf] }
 0x101   : > { %430 = vperm.xlu1 %766, %v427_v36   ;;  %416 = vperm.xlu0 %767, %v413_v37  }
 0x177   : > { %v424_v38 = vpop.permute.xlu1 %423 }
 0x178   : > { %426 = vst [vmem:[%s313_s6] sm:$0xf] %v424_v38 }
 0x179   : > { %842 = shalt.err (!%p839_p2)
}
 0x17a   : > { %s843_s6 = scalar_lea.hbm %s1206_s8, 64  ;;  %s847_s24 = scalar_lea.hbm %s1330_s3, 128 }
 0x17b   : > { %p844_p9 = scmp.ne.s32.totalorder %s1206_s8, %s843_s6  ;;  %p848_p6 = scmp.lt.u32.totalorder %s1206_s8, %s1330_s3 }
 0x17c   : > { %p849_p13 = scmp.lt.u32.totalorder %s847_s24, %s843_s6  ;;  %p851_p8 = scmp.lt.u32.totalorder %s843_s6, %s1206_s8 }
 0x17d   : > { %p845_p11 = pnand %p844_p9, %p1346_p0 }
 0x17e   : > { %p850_p5 = por %p849_p13, %p848_p6 }
 0x17f   : > { %p846_p3 = pneg %p845_p11 }
 0x180   : > { %p852_p7 = por %p851_p8, %p850_p5 }
 0x182   : > { %p853_p4 = pnand %p852_p7, %p846_p3 }
 0x184   : > { %856 = shalt.err (!%p853_p4)
}
 0x185   : > { %692 = dma.vmem_to_hbm [thread:$0]  (%p1346_p0), %s1197_s10, 64, %s1206_s8, %s1215_s21   ;;  %v431_v39 = vpop.permute.xlu1 %430  ;;  %v417_v40 = vpop.permute.xlu0 %416 }
 0x186   : > { %s1243_s26 = scalar_lea.hbm %s1329_s2, %s1195_s5  ;;  %s1252_s14 = scalar_lea.hbm %s1331_s4, %s1195_s5  ;;  %433 = vst [vmem:[%s320_s7] sm:$0xf] %v431_v39 }
 0x187   : > { %s1347_s24 = scalar_lea.vmem [#allocation10], %s1190_s27  ;;  %s435_s10 = scalar_lea.sflag [#allocation7], %s1163_s12 }
 0x188   : > { %419 = vst [vmem:[%s1347_s24] sm:$0xf] %v417_v40  ;;  %s857_s8 = scalar_lea.vmem %s1213_s22, 64  ;;  %s982_s11 = smov [#allocation10]  }
 0x189   : > { %p858_p10 = scmp.ne.s32.totalorder %s1213_s22, %s857_s8  ;;  %s861_s25 = sshll.u32 %s982_s11, 4  ;;  %s862_s25 = int_to_ptr.vmem [resolvable:$false] %s861_s25 }
 0x18a   : > { %s863_s13 = scalar_lea.vmem %s862_s25, 128  ;;  %p864_p2 = scmp.lt.s32.totalorder %s1213_s22, %s862_s25 }
 0x18b   : > { %p859_p12 = pnand %p858_p10, %p1346_p0  ;;  %p865_p9 = scmp.lt.s32.totalorder %s863_s13, %s857_s8 }
 0x18d   : > { %p860_p1 = pneg %p859_p12  ;;  %p866_p11 = por %p865_p9, %p864_p2 }
 0x18f   : > { %p867_p3 = pnand %p866_p11, %p860_p1 }
 0x191   : > { %870 = shalt.err (!%p867_p3)
}
 0x192   : > { %s871_s12 = scalar_lea.hbm %s1243_s26, 64  ;;  %s875_s7 = scalar_lea.hbm %s1329_s2, 128 }
 0x193   : > { %p872_p6 = scmp.ne.s32.totalorder %s1243_s26, %s871_s12  ;;  %p876_p8 = scmp.lt.u32.totalorder %s1243_s26, %s1329_s2 }
 0x194   : > { %p877_p7 = scmp.lt.u32.totalorder %s875_s7, %s871_s12  ;;  %p879_p10 = scmp.lt.u32.totalorder %s871_s12, %s1243_s26 }
 0x195   : > { %p873_p13 = pnand %p872_p6, %p1346_p0 }
 0x196   : > { %p878_p4 = por %p877_p7, %p876_p8 }
 0x197   : > { %p874_p5 = pneg %p873_p13 }
 0x198   : > { %p880_p12 = por %p879_p10, %p878_p4 }
 0x19a   : > { %p881_p1 = pnand %p880_p12, %p874_p5 }
 0x19c   : > { %884 = shalt.err (!%p881_p1)
}
 0x19d   : > { %691 = dma.vmem_to_hbm [thread:$0]  (%p1346_p0), %s1213_s22, 64, %s1243_s26, %s435_s10  }
 0x19e   : > { %s885_s24 = scalar_lea.vmem %s1246_s18, 64  ;;  %s983_s8 = smov [#allocation13]  }
 0x19f   : > { %p886_p2 = scmp.ne.s32.totalorder %s1246_s18, %s885_s24  ;;  %s889_s11 = sshll.u32 %s983_s8, 4  ;;  %s890_s11 = int_to_ptr.vmem [resolvable:$false] %s889_s11 }
 0x1a0   : > { %s891_s25 = scalar_lea.vmem %s890_s11, 128  ;;  %p892_p3 = scmp.lt.s32.totalorder %s1246_s18, %s890_s11 }
 0x1a1   : > { %p887_p9 = pnand %p886_p2, %p1346_p0  ;;  %p893_p6 = scmp.lt.s32.totalorder %s891_s25, %s885_s24 }
 0x1a3   : > { %p888_p11 = pneg %p887_p9  ;;  %p894_p13 = por %p893_p6, %p892_p3 }
 0x1a5   : > { %p895_p5 = pnand %p894_p13, %p888_p11 }
 0x1a7   : > { %898 = shalt.err (!%p895_p5)
}
 0x1a8   : > { %s899_s22 = scalar_lea.hbm %s1252_s14, 64  ;;  %s903_s13 = scalar_lea.hbm %s1331_s4, 128 }
 0x1a9   : > { %p900_p8 = scmp.ne.s32.totalorder %s1252_s14, %s899_s22  ;;  %p904_p10 = scmp.lt.u32.totalorder %s1252_s14, %s1331_s4 }
 0x1aa   : > { %p905_p12 = scmp.lt.u32.totalorder %s903_s13, %s899_s22  ;;  %p907_p2 = scmp.lt.u32.totalorder %s899_s22, %s1252_s14 }
 0x1ab   : > { %p901_p7 = pnand %p900_p8, %p1346_p0 }
 0x1ac   : > { %p906_p1 = por %p905_p12, %p904_p10 }
 0x1ad   : > { %p902_p4 = pneg %p901_p7 }
 0x1ae   : > { %p908_p9 = por %p907_p2, %p906_p1 }
 0x1b0   : > { %p909_p11 = pnand %p908_p9, %p902_p4 }
 0x1b2   : > { %912 = shalt.err (!%p909_p11)
}
 0x1b3   : > { %693 = dma.vmem_to_hbm [thread:$0]  (%p1346_p0), %s1246_s18, 64, %s1252_s14, %s1215_s21  }
 0x1b4 PF: > { %s499_s5 = sand.u32 1, %s955_s15   ;;  %p1348_p3 = scmp.ne.s32.totalorder %s1339_s30, 0 }
 0x1b5   : > { %p1349_p6 = scmp.ge.s32.totalorder %s975_s20, 2  ;;  %s500_s7 = scalar_lea.sflag [#allocation7], %s499_s5 }
 0x1b7   : > { %p705_p13 = pnand %p1349_p6, %p1348_p3 }
 0x1b9   : > { %946 = dma.done.wait (!%p705_p13), %s500_s7, 64  }
 0x1ba   : > { %948 = vsyncadd (!%p705_p13), %s500_s7, 4294967232  ;;  %s1350_s6 = sadd.s32 4294967294, %s975_s20  }
 0x1bb   : > { %s508_s9 = sand.u32 1, %s1350_s6  }
 0x1bc   : > { %s509_s24 = scalar_lea.sflag [#allocation12], %s508_s9 }
 0x1bd   : > { %950 = dma.done.wait (!%p705_p13), %s509_s24, 128  }
 0x1be   : > { %952 = vsyncadd (!%p705_p13), %s509_s24, 4294967168  ;;  %s27_s20 = sadd.s32 1, %s975_s20   ;;  %s1351_s15 = smov %s959_s16 }
 0x1bf   : > { %p24_p0 = scmp.ge.s32.totalorder %s27_s20, 4   ;;  %s1352_s16 = smov %s963_s17 }
 0x1c0   : > { %s1353_s17 = smov %s1071_s29  ;;  %s1354_s18 = smov %s971_s19 }
 0x1c1   : > { %s1355_s19 = smov %s1357_s23  ;;  %26 = sbr.rel (!%p24_p0) target bundleno = 10 (0xa), region = 126 }
 0x1c8   :  { %523 = vsyncpa [#allocation6], 1 }
 0x1c9   :  { %525 = vsyncpa [#allocation6 + $0x1], 1 }
 0x1ca   :  { %526 = vsyncpa [#allocation9], 1 }
 0x1cb   :  { %528 = vsyncpa [#allocation9 + $0x1], 1 }
 0x1cc   :  { %529 = vsyncpa [#allocation7], 1 }
 0x1cd   :  { %531 = vsyncpa [#allocation7 + $0x1], 1 }
 0x1ce   :  { %532 = vsyncpa [#allocation12], 1 }
 0x1cf   :  { %534 = vsyncpa [#allocation12 + $0x1], 1 }

</bundles_post_ra>
